<compile_context>
chip_gen: v6e
topology: v6e:2x2x1
jax: 0.10.0
libtpu: 0.0.40
codegen_flags: <defaults>
</compile_context>

<pallas_src>
import functools
import math

import jax
import jax.numpy as jnp
from jax import lax
from jax.experimental import pallas as pl
from jax.experimental.pallas import tpu as pltpu


def _imha_kernel(q_ref, k_ref, v_ref,
                 wq_ref, bq_ref, wk_ref, bk_ref,
                 wv_ref, bv_ref, wf_ref, mask_ref,
                 out_ref, attn_ref,
                 *, num_heads, dim_head, compute_dtype):
    """Grid = (B, S // block_q). One (batch, query-tile) step; heads fused."""
    f32 = jnp.float32

    q = q_ref[0]                                                   # (tq, D)
    k = k_ref[0]                                                   # (S, D)
    v = v_ref[0]                                                   # (S, D)

    # Fused projections for ALL heads at once. Weights are (in, out); the
    # query-side 1/sqrt(dim_head) is already folded into wq/bq by the wrapper.
    q_all = jnp.dot(q, wq_ref[...], preferred_element_type=f32) + bq_ref[...]  # (tq, H*dh)
    k_all = jnp.dot(k, wk_ref[...], preferred_element_type=f32) + bk_ref[...]  # (S,  H*dh)
    vproj = jnp.dot(v, wv_ref[...], preferred_element_type=f32) + bv_ref[...]  # (S,  dh)
    vproj_c = vproj.astype(compute_dtype)

    mask = mask_ref[0].astype(f32)                                 # int8 -> f32 (tq, S)
    neg_inf = jnp.float32(-1e9)

    head_sum = None
    for h in range(num_heads):                                     # static unroll (H small)
        lo = h * dim_head
        q_h = q_all[:, lo:lo + dim_head].astype(compute_dtype)     # (tq, dh)
        k_h = k_all[:, lo:lo + dim_head].astype(compute_dtype)     # (S, dh)

        # Scores: contract over dh without an explicit transpose.
        scores = lax.dot_general(q_h, k_h, (((1,), (1,)), ((), ())),
                                 preferred_element_type=f32)       # (tq, S)
        scores = jnp.where(mask > 0, neg_inf, scores)

        # Softmax in f32; reciprocal on the EUP instead of a vector divide.
        scores = scores - jnp.max(scores, axis=-1, keepdims=True)
        num = jnp.exp(scores)
        denom = jnp.sum(num, axis=-1, keepdims=True)
        attn = num * pl.reciprocal(denom, approx=False)            # (tq, S)
        attn_ref[0, h] = attn.astype(attn_ref.dtype)

        h_out = jnp.dot(attn.astype(compute_dtype), vproj_c,
                        preferred_element_type=f32)                # (tq, dh)
        head_sum = h_out if head_sum is None else head_sum + h_out

    # Final projection; 1/num_heads already folded into wf by the wrapper.
    out_ref[0] = jnp.dot(head_sum.astype(compute_dtype), wf_ref[...],
                         preferred_element_type=f32).astype(out_ref.dtype)


def interpretable_mha(q, k, v, mask, params, num_heads,
                      *, block_q=None, compute_dtype=jnp.float32):
    B, S, D = q.shape
    dh = D // num_heads
    assert dh * num_heads == D

    if block_q is None:
        block_q = S if S <= 128 else 128
    assert S % block_q == 0 and (block_q == S or block_q % 8 == 0)
    n_qt = S // block_q
    hdh = num_heads * dh

    # ---- trace-time weight repacking (free) ----------------------------------
    inv_sqrt_dh = 1.0 / math.sqrt(dh)
    # (H, dh, D) torch (out,in) -> (D, H*dh) (in,out), with query scale folded.
    wq_all = jnp.transpose(params["wq"], (2, 0, 1)).reshape(D, hdh) * inv_sqrt_dh
    bq_all = params["bq"].reshape(1, hdh) * inv_sqrt_dh
    wk_all = jnp.transpose(params["wk"], (2, 0, 1)).reshape(D, hdh)
    bk_all = params["bk"].reshape(1, hdh)
    wv_t = params["wv"].T                                  # (D, dh)
    bv = params["bv"].reshape(1, dh)
    wf_t = params["wf"].T * (1.0 / num_heads)              # (dh, D), head-mean folded

    cd = compute_dtype
    q_c, k_c, v_c = q.astype(cd), k.astype(cd), v.astype(cd)
    wq_all = wq_all.astype(cd)
    wk_all = wk_all.astype(cd)
    wv_t = wv_t.astype(cd)
    wf_t = wf_t.astype(cd)
    bq_all = bq_all.astype(jnp.float32)
    bk_all = bk_all.astype(jnp.float32)
    bv = bv.astype(jnp.float32)
    mask_i8 = mask.astype(jnp.int8)                        # 4x fewer mask bytes

    kernel = functools.partial(_imha_kernel, num_heads=num_heads,
                               dim_head=dh, compute_dtype=cd)

    out, attn = pl.pallas_call(
        kernel,
        out_shape=(
            jax.ShapeDtypeStruct((B, S, D), jnp.float32),
            jax.ShapeDtypeStruct((B, num_heads, S, S), jnp.float32),
        ),
        grid_spec=pltpu.PrefetchScalarGridSpec(
            num_scalar_prefetch=0,
            grid=(B, n_qt),
            in_specs=[
                pl.BlockSpec((1, block_q, D), lambda b, t: (b, t, 0)),   # q tile
                pl.BlockSpec((1, S, D), lambda b, t: (b, 0, 0)),         # k
                pl.BlockSpec((1, S, D), lambda b, t: (b, 0, 0)),         # v
                pl.BlockSpec((D, hdh), lambda b, t: (0, 0)),             # Wq (in,out)
                pl.BlockSpec((1, hdh), lambda b, t: (0, 0)),             # bq
                pl.BlockSpec((D, hdh), lambda b, t: (0, 0)),             # Wk (in,out)
                pl.BlockSpec((1, hdh), lambda b, t: (0, 0)),             # bk
                pl.BlockSpec((D, dh), lambda b, t: (0, 0)),              # Wv (in,out)
                pl.BlockSpec((1, dh), lambda b, t: (0, 0)),              # bv
                pl.BlockSpec((dh, D), lambda b, t: (0, 0)),              # Wf (in,out)
                pl.BlockSpec((1, block_q, S), lambda b, t: (b, t, 0)),   # mask (int8)
            ],
            out_specs=[
                pl.BlockSpec((1, block_q, D), lambda b, t: (b, t, 0)),               # output
                pl.BlockSpec((1, num_heads, block_q, S), lambda b, t: (b, 0, t, 0)),  # attn
            ],
        ),
        compiler_params=pltpu.CompilerParams(
            dimension_semantics=("parallel", "parallel"),
            vmem_limit_bytes=64 * 1024 * 1024),
    )(q_c, k_c, v_c, wq_all, bq_all, wk_all, bk_all, wv_t, bv, wf_t, mask_i8)
    return out, attn


def reference(q, k, v, mask, params, num_heads):
    """Pure-JAX reference matching the PyTorch forward (eval mode)."""
    D = q.shape[-1]
    dh = D // num_heads
    vproj = jnp.einsum("bsd,ed->bse", v, params["wv"]) + params["bv"][0]
    outs, attns = [], []
    for h in range(num_heads):
        qh = jnp.einsum("bsd,ed->bse", q, params["wq"][h]) + params["bq"][h, 0]
        kh = jnp.einsum("bsd,ed->bse", k, params["wk"][h]) + params["bk"][h, 0]
        s = jnp.einsum("bqe,bke->bqk", qh, kh) / jnp.sqrt(jnp.float32(dh))
        s = jnp.where(mask > 0, jnp.float32(-1e9), s)
        a = jax.nn.softmax(s, axis=-1)
        attns.append(a)
        outs.append(jnp.einsum("bqk,bke->bqe", a, vproj))
    heads = jnp.stack(outs, axis=2)            # (B, S, H, dh)
    mean_head = heads.mean(axis=2)             # (B, S, dh)
    out = jnp.einsum("bse,de->bsd", mean_head, params["wf"])
    attn = jnp.stack(attns, axis=1)            # (B, H, S, S)
    return out, attn


if __name__ == "__main__":
    B, S, D, H = 2, 8, 32, 4
    dh = D // H

    key = jax.random.PRNGKey(0)
    keys = jax.random.split(key, 12)

    q = jax.random.normal(keys[0], (B, S, D), dtype=jnp.float32)
    k = jax.random.normal(keys[1], (B, S, D), dtype=jnp.float32)
    v = jax.random.normal(keys[2], (B, S, D), dtype=jnp.float32)

    # causal mask: 1.0 where j > i (masked), matching torch masked_fill semantics
    causal = (jnp.arange(S)[None, :] > jnp.arange(S)[:, None]).astype(jnp.float32)
    mask = jnp.broadcast_to(causal, (B, S, S))

    scale = 0.1
    params = {
        "wq": scale * jax.random.normal(keys[3], (H, dh, D), dtype=jnp.float32),
        "bq": scale * jax.random.normal(keys[4], (H, 1, dh), dtype=jnp.float32),
        "wk": scale * jax.random.normal(keys[5], (H, dh, D), dtype=jnp.float32),
        "bk": scale * jax.random.normal(keys[6], (H, 1, dh), dtype=jnp.float32),
        "wv": scale * jax.random.normal(keys[7], (dh, D), dtype=jnp.float32),
        "bv": scale * jax.random.normal(keys[8], (1, dh), dtype=jnp.float32),
        "wf": scale * jax.random.normal(keys[9], (D, dh), dtype=jnp.float32),
    }

    out_ref, attn_ref = reference(q, k, v, mask, params, H)

    # --- f32 path: exact semantics of the PyTorch module ---------------------
    out, attn = interpretable_mha(q, k, v, mask, params, H)
    out = jax.block_until_ready(out)
    attn = jax.block_until_ready(attn)
    assert out.shape == (B, S, D)
    assert attn.shape == (B, H, S, S)
    assert jnp.allclose(out, out_ref, atol=1e-5, rtol=1e-5)
    assert jnp.allclose(attn, attn_ref, atol=1e-5, rtol=1e-5)

    # --- bf16 MXU path (f32 accumulation / softmax): looser tolerance --------
    out_bf, attn_bf = interpretable_mha(q, k, v, mask, params, H,
                                        compute_dtype=jnp.bfloat16)
    out_bf = jax.block_until_ready(out_bf)
    attn_bf = jax.block_until_ready(attn_bf)
    assert jnp.allclose(out_bf, out_ref, atol=5e-2, rtol=5e-2)
    assert jnp.allclose(attn_bf, attn_ref, atol=5e-2, rtol=5e-2)

    print("KERNEL_OK")
</pallas_src>

<mosaic_0001>
module attributes {stable_mosaic.version = 11 : i64} {
  func.func @_imha_kernel(%arg0: i32, %arg1: i32, %arg2: memref<1x8x32xf32, #tpu.memory_space<vmem>>, %arg3: memref<1x8x32xf32, #tpu.memory_space<vmem>>, %arg4: memref<1x8x32xf32, #tpu.memory_space<vmem>>, %arg5: memref<32x32xf32, #tpu.memory_space<vmem>>, %arg6: memref<1x32xf32, #tpu.memory_space<vmem>>, %arg7: memref<32x32xf32, #tpu.memory_space<vmem>>, %arg8: memref<1x32xf32, #tpu.memory_space<vmem>>, %arg9: memref<32x8xf32, #tpu.memory_space<vmem>>, %arg10: memref<1x8xf32, #tpu.memory_space<vmem>>, %arg11: memref<8x32xf32, #tpu.memory_space<vmem>>, %arg12: memref<1x8x8xi8, #tpu.memory_space<vmem>>, %arg13: memref<1x8x32xf32, #tpu.memory_space<vmem>>, %arg14: memref<1x4x8x8xf32, #tpu.memory_space<vmem>>) attributes {dimension_semantics = [#tpu.dimension_semantics<parallel>, #tpu.dimension_semantics<parallel>], iteration_bounds = array<i64: 2, 1>, scalar_prefetch = 0 : i64, scratch_operands = 0 : i64, tpu.core_type = #tpu.core_type<tc>, window_params = [{transform_indices = @transform_0, window_bounds = array<i64: 1, 8, 32>}, {transform_indices = @transform_1, window_bounds = array<i64: 1, 8, 32>}, {transform_indices = @transform_2, window_bounds = array<i64: 1, 8, 32>}, {pipeline_mode = #tpu.pipeline_mode<synchronous>, transform_indices = @transform_3, window_bounds = array<i64: 32, 32>}, {pipeline_mode = #tpu.pipeline_mode<synchronous>, transform_indices = @transform_4, window_bounds = array<i64: 1, 32>}, {pipeline_mode = #tpu.pipeline_mode<synchronous>, transform_indices = @transform_5, window_bounds = array<i64: 32, 32>}, {pipeline_mode = #tpu.pipeline_mode<synchronous>, transform_indices = @transform_6, window_bounds = array<i64: 1, 32>}, {pipeline_mode = #tpu.pipeline_mode<synchronous>, transform_indices = @transform_7, window_bounds = array<i64: 32, 8>}, {pipeline_mode = #tpu.pipeline_mode<synchronous>, transform_indices = @transform_8, window_bounds = array<i64: 1, 8>}, {pipeline_mode = #tpu.pipeline_mode<synchronous>, transform_indices = @transform_9, window_bounds = array<i64: 8, 32>}, {transform_indices = @transform_10, window_bounds = array<i64: 1, 8, 8>}, {transform_indices = @transform_11, window_bounds = array<i64: 1, 8, 32>}, {transform_indices = @transform_12, window_bounds = array<i64: 1, 4, 8, 8>}]} {
    %c0 = arith.constant 0 : index
    %c0_0 = arith.constant 0 : index
    %c0_1 = arith.constant 0 : index
    %0 = vector.load %arg2[%c0, %c0_0, %c0_1] : memref<1x8x32xf32, #tpu.memory_space<vmem>>, vector<1x8x32xf32>
    %1 = vector.shape_cast %0 : vector<1x8x32xf32> to vector<8x32xf32>
    %c0_2 = arith.constant 0 : index
    %c0_3 = arith.constant 0 : index
    %c0_4 = arith.constant 0 : index
    %2 = vector.load %arg3[%c0_2, %c0_3, %c0_4] : memref<1x8x32xf32, #tpu.memory_space<vmem>>, vector<1x8x32xf32>
    %3 = vector.shape_cast %2 : vector<1x8x32xf32> to vector<8x32xf32>
    %c0_5 = arith.constant 0 : index
    %c0_6 = arith.constant 0 : index
    %c0_7 = arith.constant 0 : index
    %4 = vector.load %arg4[%c0_5, %c0_6, %c0_7] : memref<1x8x32xf32, #tpu.memory_space<vmem>>, vector<1x8x32xf32>
    %5 = vector.shape_cast %4 : vector<1x8x32xf32> to vector<8x32xf32>
    %c0_8 = arith.constant 0 : index
    %c0_9 = arith.constant 0 : index
    %6 = vector.load %arg5[%c0_8, %c0_9] : memref<32x32xf32, #tpu.memory_space<vmem>>, vector<32x32xf32>
    %cst = arith.constant dense<0.000000e+00> : vector<8x32xf32>
    %7 = tpu.matmul %1, %6, %cst {dimension_numbers = #tpu.dot_dimension_numbers<[1], [0], [0], [1], [0, 0, 1, 1], [], []>} : vector<8x32xf32>, vector<32x32xf32>, vector<8x32xf32> -> vector<8x32xf32>
    %c0_10 = arith.constant 0 : index
    %c0_11 = arith.constant 0 : index
    %8 = vector.load %arg6[%c0_10, %c0_11] : memref<1x32xf32, #tpu.memory_space<vmem>>, vector<1x32xf32>
    %9 = vector.broadcast %8 : vector<1x32xf32> to vector<8x32xf32>
    %10 = arith.addf %7, %9 : vector<8x32xf32>
    %c0_12 = arith.constant 0 : index
    %c0_13 = arith.constant 0 : index
    %11 = vector.load %arg7[%c0_12, %c0_13] : memref<32x32xf32, #tpu.memory_space<vmem>>, vector<32x32xf32>
    %cst_14 = arith.constant dense<0.000000e+00> : vector<8x32xf32>
    %12 = tpu.matmul %3, %11, %cst_14 {dimension_numbers = #tpu.dot_dimension_numbers<[1], [0], [0], [1], [0, 0, 1, 1], [], []>} : vector<8x32xf32>, vector<32x32xf32>, vector<8x32xf32> -> vector<8x32xf32>
    %c0_15 = arith.constant 0 : index
    %c0_16 = arith.constant 0 : index
    %13 = vector.load %arg8[%c0_15, %c0_16] : memref<1x32xf32, #tpu.memory_space<vmem>>, vector<1x32xf32>
    %14 = vector.broadcast %13 : vector<1x32xf32> to vector<8x32xf32>
    %15 = arith.addf %12, %14 : vector<8x32xf32>
    %c0_17 = arith.constant 0 : index
    %c0_18 = arith.constant 0 : index
    %16 = vector.load %arg9[%c0_17, %c0_18] : memref<32x8xf32, #tpu.memory_space<vmem>>, vector<32x8xf32>
    %cst_19 = arith.constant dense<0.000000e+00> : vector<8x8xf32>
    %17 = tpu.matmul %5, %16, %cst_19 {dimension_numbers = #tpu.dot_dimension_numbers<[1], [0], [0], [1], [0, 0, 1, 1], [], []>} : vector<8x32xf32>, vector<32x8xf32>, vector<8x8xf32> -> vector<8x8xf32>
    %c0_20 = arith.constant 0 : index
    %c0_21 = arith.constant 0 : index
    %18 = vector.load %arg10[%c0_20, %c0_21] : memref<1x8xf32, #tpu.memory_space<vmem>>, vector<1x8xf32>
    %19 = vector.broadcast %18 : vector<1x8xf32> to vector<8x8xf32>
    %20 = arith.addf %17, %19 : vector<8x8xf32>
    %c0_22 = arith.constant 0 : index
    %c0_23 = arith.constant 0 : index
    %c0_24 = arith.constant 0 : index
    %21 = vector.load %arg12[%c0_22, %c0_23, %c0_24] : memref<1x8x8xi8, #tpu.memory_space<vmem>>, vector<1x8x8xi8>
    %22 = vector.shape_cast %21 : vector<1x8x8xi8> to vector<8x8xi8>
    %23 = arith.sitofp %22 : vector<8x8xi8> to vector<8x8xf32>
    %24 = vector.extract_strided_slice %10 {offsets = [0, 0], sizes = [8, 8], strides = [1, 1]} : vector<8x32xf32> to vector<8x8xf32>
    %25 = vector.extract_strided_slice %15 {offsets = [0, 0], sizes = [8, 8], strides = [1, 1]} : vector<8x32xf32> to vector<8x8xf32>
    %cst_25 = arith.constant dense<0.000000e+00> : vector<8x8xf32>
    %26 = tpu.matmul %24, %25, %cst_25 {dimension_numbers = #tpu.dot_dimension_numbers<[1], [1], [0], [0], [0, 0, 1, 0], [], []>} : vector<8x8xf32>, vector<8x8xf32>, vector<8x8xf32> -> vector<8x8xf32>
    %cst_26 = arith.constant 0.000000e+00 : f32
    %27 = vector.broadcast %cst_26 : f32 to vector<8x8xf32>
    %28 = arith.cmpf ogt, %23, %27 : vector<8x8xf32>
    %cst_27 = arith.constant -1.000000e+09 : f32
    %29 = vector.broadcast %cst_27 : f32 to vector<8x8xf32>
    %30 = arith.select %28, %29, %26 : vector<8x8xi1>, vector<8x8xf32>
    %cst_28 = arith.constant dense<0xFF800000> : vector<8xf32>
    %31 = vector.multi_reduction <maximumf>, %30, %cst_28 [1] : vector<8x8xf32> to vector<8xf32>
    %32 = vector.shape_cast %31 : vector<8xf32> to vector<8x1xf32>
    %33 = vector.broadcast %32 : vector<8x1xf32> to vector<8x8xf32>
    %34 = arith.subf %30, %33 : vector<8x8xf32>
    %35 = math.exp %34 : vector<8x8xf32>
    %cst_29 = arith.constant dense<0.000000e+00> : vector<8xf32>
    %36 = vector.multi_reduction <add>, %35, %cst_29 [1] : vector<8x8xf32> to vector<8xf32>
    %37 = vector.shape_cast %36 : vector<8xf32> to vector<8x1xf32>
    %38 = tpu.reciprocal %37 : vector<8x1xf32> -> vector<8x1xf32>
    %39 = vector.broadcast %38 : vector<8x1xf32> to vector<8x8xf32>
    %40 = arith.mulf %35, %39 : vector<8x8xf32>
    %c0_30 = arith.constant 0 : index
    %c0_31 = arith.constant 0 : index
    %c0_32 = arith.constant 0 : index
    %c0_33 = arith.constant 0 : index
    %41 = vector.load %arg14[%c0_30, %c0_31, %c0_32, %c0_33] : memref<1x4x8x8xf32, #tpu.memory_space<vmem>>, vector<1x1x8x8xf32>
    %42 = vector.shape_cast %41 : vector<1x1x8x8xf32> to vector<8x8xf32>
    %43 = vector.shape_cast %40 : vector<8x8xf32> to vector<1x1x8x8xf32>
    tpu.vector_store %arg14[%c0_30, %c0_31, %c0_32, %c0_33], %43 {strides = array<i32>} : memref<1x4x8x8xf32, #tpu.memory_space<vmem>>, vector<1x1x8x8xf32>,
    %cst_34 = arith.constant dense<0.000000e+00> : vector<8x8xf32>
    %44 = tpu.matmul %40, %20, %cst_34 {dimension_numbers = #tpu.dot_dimension_numbers<[1], [0], [0], [1], [0, 0, 1, 1], [], []>} : vector<8x8xf32>, vector<8x8xf32>, vector<8x8xf32> -> vector<8x8xf32>
    %45 = vector.extract_strided_slice %10 {offsets = [0, 8], sizes = [8, 8], strides = [1, 1]} : vector<8x32xf32> to vector<8x8xf32>
    %46 = vector.extract_strided_slice %15 {offsets = [0, 8], sizes = [8, 8], strides = [1, 1]} : vector<8x32xf32> to vector<8x8xf32>
    %cst_35 = arith.constant dense<0.000000e+00> : vector<8x8xf32>
    %47 = tpu.matmul %45, %46, %cst_35 {dimension_numbers = #tpu.dot_dimension_numbers<[1], [1], [0], [0], [0, 0, 1, 0], [], []>} : vector<8x8xf32>, vector<8x8xf32>, vector<8x8xf32> -> vector<8x8xf32>
    %cst_36 = arith.constant 0.000000e+00 : f32
    %48 = vector.broadcast %cst_36 : f32 to vector<8x8xf32>
    %49 = arith.cmpf ogt, %23, %48 : vector<8x8xf32>
    %cst_37 = arith.constant -1.000000e+09 : f32
    %50 = vector.broadcast %cst_37 : f32 to vector<8x8xf32>
    %51 = arith.select %49, %50, %47 : vector<8x8xi1>, vector<8x8xf32>
    %cst_38 = arith.constant dense<0xFF800000> : vector<8xf32>
    %52 = vector.multi_reduction <maximumf>, %51, %cst_38 [1] : vector<8x8xf32> to vector<8xf32>
    %53 = vector.shape_cast %52 : vector<8xf32> to vector<8x1xf32>
    %54 = vector.broadcast %53 : vector<8x1xf32> to vector<8x8xf32>
    %55 = arith.subf %51, %54 : vector<8x8xf32>
    %56 = math.exp %55 : vector<8x8xf32>
    %cst_39 = arith.constant dense<0.000000e+00> : vector<8xf32>
    %57 = vector.multi_reduction <add>, %56, %cst_39 [1] : vector<8x8xf32> to vector<8xf32>
    %58 = vector.shape_cast %57 : vector<8xf32> to vector<8x1xf32>
    %59 = tpu.reciprocal %58 : vector<8x1xf32> -> vector<8x1xf32>
    %60 = vector.broadcast %59 : vector<8x1xf32> to vector<8x8xf32>
    %61 = arith.mulf %56, %60 : vector<8x8xf32>
    %c0_40 = arith.constant 0 : index
    %c1 = arith.constant 1 : index
    %c0_41 = arith.constant 0 : index
    %c0_42 = arith.constant 0 : index
    %62 = vector.load %arg14[%c0_40, %c1, %c0_41, %c0_42] : memref<1x4x8x8xf32, #tpu.memory_space<vmem>>, vector<1x1x8x8xf32>
    %63 = vector.shape_cast %62 : vector<1x1x8x8xf32> to vector<8x8xf32>
    %64 = vector.shape_cast %61 : vector<8x8xf32> to vector<1x1x8x8xf32>
    tpu.vector_store %arg14[%c0_40, %c1, %c0_41, %c0_42], %64 {strides = array<i32>} : memref<1x4x8x8xf32, #tpu.memory_space<vmem>>, vector<1x1x8x8xf32>,
    %cst_43 = arith.constant dense<0.000000e+00> : vector<8x8xf32>
    %65 = tpu.matmul %61, %20, %cst_43 {dimension_numbers = #tpu.dot_dimension_numbers<[1], [0], [0], [1], [0, 0, 1, 1], [], []>} : vector<8x8xf32>, vector<8x8xf32>, vector<8x8xf32> -> vector<8x8xf32>
    %66 = arith.addf %44, %65 : vector<8x8xf32>
    %67 = vector.extract_strided_slice %10 {offsets = [0, 16], sizes = [8, 8], strides = [1, 1]} : vector<8x32xf32> to vector<8x8xf32>
    %68 = vector.extract_strided_slice %15 {offsets = [0, 16], sizes = [8, 8], strides = [1, 1]} : vector<8x32xf32> to vector<8x8xf32>
    %cst_44 = arith.constant dense<0.000000e+00> : vector<8x8xf32>
    %69 = tpu.matmul %67, %68, %cst_44 {dimension_numbers = #tpu.dot_dimension_numbers<[1], [1], [0], [0], [0, 0, 1, 0], [], []>} : vector<8x8xf32>, vector<8x8xf32>, vector<8x8xf32> -> vector<8x8xf32>
    %cst_45 = arith.constant 0.000000e+00 : f32
    %70 = vector.broadcast %cst_45 : f32 to vector<8x8xf32>
    %71 = arith.cmpf ogt, %23, %70 : vector<8x8xf32>
    %cst_46 = arith.constant -1.000000e+09 : f32
    %72 = vector.broadcast %cst_46 : f32 to vector<8x8xf32>
    %73 = arith.select %71, %72, %69 : vector<8x8xi1>, vector<8x8xf32>
    %cst_47 = arith.constant dense<0xFF800000> : vector<8xf32>
    %74 = vector.multi_reduction <maximumf>, %73, %cst_47 [1] : vector<8x8xf32> to vector<8xf32>
    %75 = vector.shape_cast %74 : vector<8xf32> to vector<8x1xf32>
    %76 = vector.broadcast %75 : vector<8x1xf32> to vector<8x8xf32>
    %77 = arith.subf %73, %76 : vector<8x8xf32>
    %78 = math.exp %77 : vector<8x8xf32>
    %cst_48 = arith.constant dense<0.000000e+00> : vector<8xf32>
    %79 = vector.multi_reduction <add>, %78, %cst_48 [1] : vector<8x8xf32> to vector<8xf32>
    %80 = vector.shape_cast %79 : vector<8xf32> to vector<8x1xf32>
    %81 = tpu.reciprocal %80 : vector<8x1xf32> -> vector<8x1xf32>
    %82 = vector.broadcast %81 : vector<8x1xf32> to vector<8x8xf32>
    %83 = arith.mulf %78, %82 : vector<8x8xf32>
    %c0_49 = arith.constant 0 : index
    %c2 = arith.constant 2 : index
    %c0_50 = arith.constant 0 : index
    %c0_51 = arith.constant 0 : index
    %84 = vector.load %arg14[%c0_49, %c2, %c0_50, %c0_51] : memref<1x4x8x8xf32, #tpu.memory_space<vmem>>, vector<1x1x8x8xf32>
    %85 = vector.shape_cast %84 : vector<1x1x8x8xf32> to vector<8x8xf32>
    %86 = vector.shape_cast %83 : vector<8x8xf32> to vector<1x1x8x8xf32>
    tpu.vector_store %arg14[%c0_49, %c2, %c0_50, %c0_51], %86 {strides = array<i32>} : memref<1x4x8x8xf32, #tpu.memory_space<vmem>>, vector<1x1x8x8xf32>,
    %cst_52 = arith.constant dense<0.000000e+00> : vector<8x8xf32>
    %87 = tpu.matmul %83, %20, %cst_52 {dimension_numbers = #tpu.dot_dimension_numbers<[1], [0], [0], [1], [0, 0, 1, 1], [], []>} : vector<8x8xf32>, vector<8x8xf32>, vector<8x8xf32> -> vector<8x8xf32>
    %88 = arith.addf %66, %87 : vector<8x8xf32>
    %89 = vector.extract_strided_slice %10 {offsets = [0, 24], sizes = [8, 8], strides = [1, 1]} : vector<8x32xf32> to vector<8x8xf32>
    %90 = vector.extract_strided_slice %15 {offsets = [0, 24], sizes = [8, 8], strides = [1, 1]} : vector<8x32xf32> to vector<8x8xf32>
    %cst_53 = arith.constant dense<0.000000e+00> : vector<8x8xf32>
    %91 = tpu.matmul %89, %90, %cst_53 {dimension_numbers = #tpu.dot_dimension_numbers<[1], [1], [0], [0], [0, 0, 1, 0], [], []>} : vector<8x8xf32>, vector<8x8xf32>, vector<8x8xf32> -> vector<8x8xf32>
    %cst_54 = arith.constant 0.000000e+00 : f32
    %92 = vector.broadcast %cst_54 : f32 to vector<8x8xf32>
    %93 = arith.cmpf ogt, %23, %92 : vector<8x8xf32>
    %cst_55 = arith.constant -1.000000e+09 : f32
    %94 = vector.broadcast %cst_55 : f32 to vector<8x8xf32>
    %95 = arith.select %93, %94, %91 : vector<8x8xi1>, vector<8x8xf32>
    %cst_56 = arith.constant dense<0xFF800000> : vector<8xf32>
    %96 = vector.multi_reduction <maximumf>, %95, %cst_56 [1] : vector<8x8xf32> to vector<8xf32>
    %97 = vector.shape_cast %96 : vector<8xf32> to vector<8x1xf32>
    %98 = vector.broadcast %97 : vector<8x1xf32> to vector<8x8xf32>
    %99 = arith.subf %95, %98 : vector<8x8xf32>
    %100 = math.exp %99 : vector<8x8xf32>
    %cst_57 = arith.constant dense<0.000000e+00> : vector<8xf32>
    %101 = vector.multi_reduction <add>, %100, %cst_57 [1] : vector<8x8xf32> to vector<8xf32>
    %102 = vector.shape_cast %101 : vector<8xf32> to vector<8x1xf32>
    %103 = tpu.reciprocal %102 : vector<8x1xf32> -> vector<8x1xf32>
    %104 = vector.broadcast %103 : vector<8x1xf32> to vector<8x8xf32>
    %105 = arith.mulf %100, %104 : vector<8x8xf32>
    %c0_58 = arith.constant 0 : index
    %c3 = arith.constant 3 : index
    %c0_59 = arith.constant 0 : index
    %c0_60 = arith.constant 0 : index
    %106 = vector.load %arg14[%c0_58, %c3, %c0_59, %c0_60] : memref<1x4x8x8xf32, #tpu.memory_space<vmem>>, vector<1x1x8x8xf32>
    %107 = vector.shape_cast %106 : vector<1x1x8x8xf32> to vector<8x8xf32>
    %108 = vector.shape_cast %105 : vector<8x8xf32> to vector<1x1x8x8xf32>
    tpu.vector_store %arg14[%c0_58, %c3, %c0_59, %c0_60], %108 {strides = array<i32>} : memref<1x4x8x8xf32, #tpu.memory_space<vmem>>, vector<1x1x8x8xf32>,
    %cst_61 = arith.constant dense<0.000000e+00> : vector<8x8xf32>
    %109 = tpu.matmul %105, %20, %cst_61 {dimension_numbers = #tpu.dot_dimension_numbers<[1], [0], [0], [1], [0, 0, 1, 1], [], []>} : vector<8x8xf32>, vector<8x8xf32>, vector<8x8xf32> -> vector<8x8xf32>
    %110 = arith.addf %88, %109 : vector<8x8xf32>
    %c0_62 = arith.constant 0 : index
    %c0_63 = arith.constant 0 : index
    %111 = vector.load %arg11[%c0_62, %c0_63] : memref<8x32xf32, #tpu.memory_space<vmem>>, vector<8x32xf32>
    %cst_64 = arith.constant dense<0.000000e+00> : vector<8x32xf32>
    %112 = tpu.matmul %110, %111, %cst_64 {dimension_numbers = #tpu.dot_dimension_numbers<[1], [0], [0], [1], [0, 0, 1, 1], [], []>} : vector<8x8xf32>, vector<8x32xf32>, vector<8x32xf32> -> vector<8x32xf32>
    %c0_65 = arith.constant 0 : index
    %c0_66 = arith.constant 0 : index
    %c0_67 = arith.constant 0 : index
    %113 = vector.load %arg13[%c0_65, %c0_66, %c0_67] : memref<1x8x32xf32, #tpu.memory_space<vmem>>, vector<1x8x32xf32>
    %114 = vector.shape_cast %113 : vector<1x8x32xf32> to vector<8x32xf32>
    %115 = vector.shape_cast %112 : vector<8x32xf32> to vector<1x8x32xf32>
    tpu.vector_store %arg13[%c0_65, %c0_66, %c0_67], %115 {strides = array<i32>} : memref<1x8x32xf32, #tpu.memory_space<vmem>>, vector<1x8x32xf32>,
    return
  }
  func.func @transform_0(%arg0: i32, %arg1: i32) -> (i32, i32, i32) {
    %c0_i32 = arith.constant 0 : i32
    %c0_i32_0 = arith.constant 0 : i32
    return %arg0, %arg1, %c0_i32 : i32, i32, i32
  }
  func.func @transform_1(%arg0: i32, %arg1: i32) -> (i32, i32, i32) {
    %c0_i32 = arith.constant 0 : i32
    %c0_i32_0 = arith.constant 0 : i32
    %c0_i32_1 = arith.constant 0 : i32
    return %arg0, %c0_i32, %c0_i32_0 : i32, i32, i32
  }
  func.func @transform_2(%arg0: i32, %arg1: i32) -> (i32, i32, i32) {
    %c0_i32 = arith.constant 0 : i32
    %c0_i32_0 = arith.constant 0 : i32
    %c0_i32_1 = arith.constant 0 : i32
    return %arg0, %c0_i32, %c0_i32_0 : i32, i32, i32
  }
  func.func @transform_3(%arg0: i32, %arg1: i32) -> (i32, i32) {
    %c0_i32 = arith.constant 0 : i32
    %c0_i32_0 = arith.constant 0 : i32
    %c0_i32_1 = arith.constant 0 : i32
    return %c0_i32, %c0_i32_0 : i32, i32
  }
  func.func @transform_4(%arg0: i32, %arg1: i32) -> (i32, i32) {
    %c0_i32 = arith.constant 0 : i32
    %c0_i32_0 = arith.constant 0 : i32
    %c0_i32_1 = arith.constant 0 : i32
    return %c0_i32, %c0_i32_0 : i32, i32
  }
  func.func @transform_5(%arg0: i32, %arg1: i32) -> (i32, i32) {
    %c0_i32 = arith.constant 0 : i32
    %c0_i32_0 = arith.constant 0 : i32
    %c0_i32_1 = arith.constant 0 : i32
    return %c0_i32, %c0_i32_0 : i32, i32
  }
  func.func @transform_6(%arg0: i32, %arg1: i32) -> (i32, i32) {
    %c0_i32 = arith.constant 0 : i32
    %c0_i32_0 = arith.constant 0 : i32
    %c0_i32_1 = arith.constant 0 : i32
    return %c0_i32, %c0_i32_0 : i32, i32
  }
  func.func @transform_7(%arg0: i32, %arg1: i32) -> (i32, i32) {
    %c0_i32 = arith.constant 0 : i32
    %c0_i32_0 = arith.constant 0 : i32
    %c0_i32_1 = arith.constant 0 : i32
    return %c0_i32, %c0_i32_0 : i32, i32
  }
  func.func @transform_8(%arg0: i32, %arg1: i32) -> (i32, i32) {
    %c0_i32 = arith.constant 0 : i32
    %c0_i32_0 = arith.constant 0 : i32
    %c0_i32_1 = arith.constant 0 : i32
    return %c0_i32, %c0_i32_0 : i32, i32
  }
  func.func @transform_9(%arg0: i32, %arg1: i32) -> (i32, i32) {
    %c0_i32 = arith.constant 0 : i32
    %c0_i32_0 = arith.constant 0 : i32
    %c0_i32_1 = arith.constant 0 : i32
    return %c0_i32, %c0_i32_0 : i32, i32
  }
  func.func @transform_10(%arg0: i32, %arg1: i32) -> (i32, i32, i32) {
    %c0_i32 = arith.constant 0 : i32
    %c0_i32_0 = arith.constant 0 : i32
    return %arg0, %arg1, %c0_i32 : i32, i32, i32
  }
  func.func @transform_11(%arg0: i32, %arg1: i32) -> (i32, i32, i32) {
    %c0_i32 = arith.constant 0 : i32
    %c0_i32_0 = arith.constant 0 : i32
    return %arg0, %arg1, %c0_i32 : i32, i32, i32
  }
  func.func @transform_12(%arg0: i32, %arg1: i32) -> (i32, i32, i32, i32) {
    %c0_i32 = arith.constant 0 : i32
    %c0_i32_0 = arith.constant 0 : i32
    %c0_i32_1 = arith.constant 0 : i32
    return %arg0, %c0_i32, %arg1, %c0_i32_0 : i32, i32, i32, i32
  }
}

</mosaic_0001>

<bundles_post_ra>
// kernel: tpu_custom_call.1
= control target key start
LH: loop header
LB: loop body
LE: loop exit
PB: predicated region body
PF: predicated region fallthrough
CT: control target
= control target key end

     0   :  { %s2920_s0 = inlined_call_operand.hbm [shape: f32[2,8,32], index: 0, kind: input, shape index: {}]   ;;  %s2921_s1 = inlined_call_operand.hbm [shape: f32[2,8,32], index: 1, kind: input, shape index: {}]   ;;  %s2922_s2 = inlined_call_operand.hbm [shape: f32[2,8,32], index: 2, kind: input, shape index: {}]   ;;  %s2923_s3 = inlined_call_operand.vmem [shape: f32[32,32], index: 3, kind: input, shape index: {}]   ;;  %s2924_s4 = inlined_call_operand.hbm [shape: f32[1,32], index: 4, kind: input, shape index: {}]   ;;  %s2925_s5 = inlined_call_operand.hbm [shape: f32[32,32], index: 5, kind: input, shape index: {}]   ;;  %s2926_s6 = inlined_call_operand.hbm [shape: f32[1,32], index: 6, kind: input, shape index: {}]   ;;  %s2927_s7 = inlined_call_operand.vmem [shape: f32[32,8], index: 7, kind: input, shape index: {}]   ;;  %s2928_s8 = inlined_call_operand.vmem [shape: f32[1,8], index: 8, kind: input, shape index: {}]   ;;  %s2929_s9 = inlined_call_operand.vmem [shape: f32[8,32], index: 9, kind: input, shape index: {}]   ;;  %s2930_s10 = inlined_call_operand.vmem [shape: s8[2,8,8], index: 10, kind: input, shape index: {}]   ;;  %s2931_s11 = inlined_call_operand.hbm [shape: f32[2,8,32], index: 11, kind: output, shape index: {0}]   ;;  %s2932_s12 = inlined_call_operand.hbm [shape: f32[2,4,8,8], index: 12, kind: output, shape index: {1}]  }
   0x1   :  { %2950 = sst [smem:[#allocation29_spill]] %s2924_s4 }
   0x2   :  { %2951 = sst [smem:[#allocation30_spill]] %s2929_s9 }
   0x3   :  { %2952 = sst [smem:[#allocation31_spill]] %s2931_s11 }
   0x4   :  { %2953 = sst [smem:[#allocation32_spill]] %s2932_s12 }
   0x5   :  { %18 = vsyncpa [#allocation3], 0 }
   0x6   :  { %20 = vsyncpa [#allocation3 + $0x1], 0 }
   0x7   :  { %21 = vsyncpa [#allocation6], 0 }
   0x8   :  { %23 = vsyncpa [#allocation6 + $0x1], 0 }
   0x9   :  { %24 = vsyncpa [#allocation9], 0 }
   0xa   :  { %25 = vsyncpa [#allocation12], 0 }
   0xb   :  { %26 = vsyncpa [#allocation4], 0 }
   0xc   :  { %28 = vsyncpa [#allocation4 + $0x1], 0 }
   0xd   :  { %29 = vsyncpa [#allocation15], 0 }
   0xe   :  { %31 = vsyncpa [#allocation15 + $0x1], 0  ;;  %s2496_s21 = smov 0   ;;  %s2498_s22 = smov 0  }
   0xf   :  { %s2500_s23 = smov 0   ;;  %s2502_s24 = smov 0  }
  0x10   :  { %s2504_s25 = smov 0   ;;  %s2506_s26 = smov 0  }
  0x11 LB: > { %2954 = sst [smem:[#allocation22_spill]] %s2392_s21  ;;  %s2527_s27 = sadd.s32 4294967295, %s2412_s26   ;;  %s2412_s26 = sphi %s2506_s26, %s37_s26   ;;  %s2408_s25 = sphi %s2504_s25, %s2992_s25   ;;  %s2404_s24 = sphi %s2502_s24, %s2991_s24   ;;  %s2400_s23 = sphi %s2500_s23, %s2995_s23   ;;  %s2396_s22 = sphi %s2498_s22, %s2994_s22   ;;  %s2392_s21 = sphi %s2496_s21, %s2993_s21  }
  0x12   : > { %2955 = sst [smem:[#allocation23_spill]] %s2408_s25  ;;  %s1832_s28 = sadd.s32 4294967294, %s2412_s26  }
  0x13   : > { %2956 = sst [smem:[#allocation24_spill]] %s2412_s26  ;;  %p71_p0 = scmp.ne.s32.totalorder %s2396_s22, %s2392_s21 }
  0x14   : > { %p2933_p1 = scmp.eq.s32.totalorder %s2527_s27, 0  ;;  %p324_p2 = scmp.eq.s32.totalorder %s2527_s27, 1 }
  0x15   : > { %p330_p3 = scmp.eq.s32.totalorder %s1832_s28, 1  ;;  %p1833_p5 = scmp.ge.s32.totalorder %s2412_s26, 1 }
  0x16   : > { %p2536_p4 = por %p2933_p1, %p71_p0  ;;  %p365_p7 = scmp.lt.s32.totalorder %s2412_s26, 3 }
  0x17   : > { %p2541_p6 = por %p330_p3, %p71_p0  ;;  %s2414_s14 = smov [#allocation8]  }
  0x18   : > { %s2957_s29 = scalar_select %p2536_p4, 1, 0 }
  0x19   : > { %s2958_s30 = scalar_select %p2541_p6, 1, 0 }
  0x1a   : > { %p2546_p8 = pnand %p1833_p5, %p365_p7  ;;  %s381_s15 = sshll.u32 %s2414_s14, 4  ;;  %s382_s15 = int_to_ptr.vmem [resolvable:$true] %s381_s15 }
  0x1b   : > { %2959 = sst [smem:[#allocation25_spill]] %s2958_s30  ;;  %s49_s17 = sadd.s32 1, %s2408_s25 }
  0x1c   : > { %s2960_s13 = scalar_select %p2546_p8, 1, 0 }
  0x1d   : > { %p2017_p10 = pneg %p2546_p8  ;;  %s58_s18 = sadd.s32 1, %s2400_s23 }
  0x1e   : > { %p51_p12 = scmp.ge.s32.totalorder %s49_s17, 2  ;;  %s2139_s19 = scalar_lea.vmem %s382_s15, 16 }
  0x1f   : > { %p2555_p11 = pnand %p2017_p10, %p2933_p1  ;;  %p2140_p0 = scmp.ne.s32.totalorder %s382_s15, %s2139_s19 }
  0x20   : > { %s2146_s20 = scalar_lea.vmem %s382_s15, 32  ;;  %p2147_p7 = scmp.lt.s32.totalorder %s382_s15, %s382_s15 }
  0x21   : > { %p2945_p13 = pneg %p2555_p11  ;;  %p2148_p9 = scmp.lt.s32.totalorder %s2146_s20, %s2139_s19 }
  0x23   : > { %p2142_p3 = pnand %p2140_p0, %p2945_p13  ;;  %p2149_p10 = por %p2148_p9, %p2147_p7 }
  0x25   : > { %p2143_p5 = pneg %p2142_p3 }
  0x27   : > { %p2150_p1 = pnand %p2149_p10, %p2143_p5 }
  0x29   : > { %2153 = shalt.err (!%p2150_p1)
}
  0x2a   : > { %s2962_s4 = sld [smem:[#allocation29_spill]]  ;;  %s2997_s17 = smov (%p51_p12, %s49_s17), 0 }
  0x2b   : > { %2963 = sst [smem:[#allocation26_spill]] %s2997_s17  ;;  %p65_p1 = scmp.ne.s32.totalorder %s2400_s23, %s2396_s22 }
  0x2c   : > { %p66_p9 = scmp.eq.s32.totalorder %s2412_s26, 0  ;;  %s53_s19 = ssub.s32 %s2408_s25, %s2997_s17 }
  0x2d   : > { %p2047_p0 = scmp.lt.s32.totalorder %s2412_s26, 2  ;;  %p56_p3 = scmp.eq.s32.totalorder %s53_s19, 0 }
  0x2e   : > { %p67_p5 = por %p66_p9, %p65_p1  ;;  %p2581_p7 = por %p324_p2, %p65_p1 }
  0x2f   : > { %s2938_s28 = sand.u32 1, %s2400_s23   ;;  %s444_s19 = sand.u32 1, %s2412_s26  }
  0x30   : > { %2020 = dma.hbm_to_vmem [thread:$0]  (!%p2555_p11), %s2962_s4, 16, %s382_s15, [#allocation9]  }
  0x31   : > { %s2964_s20 = scalar_select %p2581_p7, 1, 0 }
  0x32   : > { %s2587_s14 = scalar_select %p56_p3, %s2400_s23, %s58_s18  }
  0x33   : > { %2965 = sst [smem:[#allocation27_spill]] %s2964_s20  ;;  %s2591_s30 = sshll.u32 %s2938_s28, 3 }
  0x34   : > { %2966 = sst [smem:[#allocation28_spill]] %s2587_s14  ;;  %s2594_s15 = sshll.u32 %s2408_s25, 7 }
  0x35   : > { %p2596_p12 = pnand %p2047_p0, %p67_p5  ;;  %s453_s11 = scalar_lea.hbm %s2921_s1, %s2594_s15 }
  0x36   : > { %s448_s18 = scalar_lea.vmem [#allocation5], %s2591_s30  ;;  %s2415_s28 = smov [#allocation10]  }
  0x37   : > { %s455_s14 = sshll.u32 %s448_s18, 4  ;;  %s391_s12 = sshll.u32 %s2415_s28, 4  ;;  %s456_s14 = int_to_ptr.vmem [resolvable:$true] %s455_s14  ;;  %s392_s12 = int_to_ptr.vmem [resolvable:$true] %s391_s12 }
  0x38   : > { %s2606_s20 = scalar_lea.sflag [#allocation6], %s444_s19  ;;  %p2946_p2 = pneg %p2596_p12 }
  0x39   : > { %s2167_s25 = scalar_lea.vmem %s456_s14, 128  ;;  %s2416_s26 = smov [#allocation5]  }
  0x3a   : > { %p2168_p10 = scmp.ne.s32.totalorder %s456_s14, %s2167_s25  ;;  %s2172_s9 = sshll.u32 %s2416_s26, 4  ;;  %s2173_s9 = int_to_ptr.vmem [resolvable:$false] %s2172_s9 }
  0x3b   : > { %s2174_s21 = scalar_lea.vmem %s2173_s9, 256  ;;  %p2175_p0 = scmp.lt.s32.totalorder %s456_s14, %s2173_s9 }
  0x3c   : > { %p2170_p1 = pnand %p2168_p10, %p2946_p2  ;;  %p2176_p3 = scmp.lt.s32.totalorder %s2174_s21, %s2167_s25 }
  0x3e   : > { %p2171_p9 = pneg %p2170_p1  ;;  %p2177_p5 = por %p2176_p3, %p2175_p0 }
  0x40   : > { %p2178_p13 = pnand %p2177_p5, %p2171_p9 }
  0x42   : > { %2181 = shalt.err (!%p2178_p13)
}
  0x43   : > { %2033 = dma.hbm_to_vmem [thread:$0]  (!%p2596_p12), %s453_s11, 128, %s456_s14, %s2606_s20  }
  0x44   : > { %s2193_s17 = scalar_lea.vmem %s392_s12, 512  ;;  %p2968_p10 = pneg %p2555_p11 }
  0x45   : > { %p2194_p6 = scmp.ne.s32.totalorder %s392_s12, %s2193_s17  ;;  %p2201_p7 = scmp.lt.s32.totalorder %s392_s12, %s392_s12 }
  0x46   : > { %p2202_p4 = scmp.lt.s32.totalorder %s2193_s17, %s2193_s17 }
  0x47   : > { %p2196_p1 = pnand %p2194_p6, %p2968_p10 }
  0x48   : > { %p2203_p8 = por %p2202_p4, %p2201_p7 }
  0x49   : > { %p2197_p2 = pneg %p2196_p1 }
  0x4b   : > { %p2204_p0 = pnand %p2203_p8, %p2197_p2 }
  0x4d   : > { %2207 = shalt.err (!%p2204_p0)
}
  0x4e   : > { %s2417_s9 = smov 128   ;;  %s2418_s25 = smov 8  }
  0x4f   : > { %2023 = dma.hbm_to_vmem [thread:$0]  (!%p2555_p11), %s2925_s5, 512, %s392_s12, [#allocation9], %s2417_s9, %s2417_s9, %s2418_s25  }
  0x50   : > { %s2419_s11 = smov [#allocation11]   ;;  %p2969_p13 = pmov %p2968_p10 }
  0x51   : > { %s405_s14 = sshll.u32 %s2419_s11, 4  ;;  %s406_s14 = int_to_ptr.vmem [resolvable:$true] %s405_s14 }
  0x52   : > { %s2219_s19 = scalar_lea.vmem %s406_s14, 16  ;;  %s2226_s18 = scalar_lea.vmem %s406_s14, 32 }
  0x53   : > { %p2220_p6 = scmp.ne.s32.totalorder %s406_s14, %s2219_s19  ;;  %p2227_p8 = scmp.lt.s32.totalorder %s406_s14, %s406_s14 }
  0x54   : > { %p2228_p7 = scmp.lt.s32.totalorder %s2226_s18, %s2219_s19 }
  0x55   : > { %p2222_p9 = pnand %p2220_p6, %p2969_p13 }
  0x56   : > { %p2229_p2 = por %p2228_p7, %p2227_p8 }
  0x57   : > { %p2223_p4 = pneg %p2222_p9 }
  0x59   : > { %p2230_p3 = pnand %p2229_p2, %p2223_p4 }
  0x5b   : > { %2233 = shalt.err (!%p2230_p3)
}
  0x5c   : > { %2026 = dma.hbm_to_vmem [thread:$0]  (!%p2555_p11), %s2926_s6, 16, %s406_s14, [#allocation12]  }
  0x5d   : > { %s435_s25 = scalar_lea.hbm %s2920_s0, %s2594_s15  ;;  %s429_s26 = scalar_lea.vmem [#allocation2], %s2591_s30 }
  0x5e   : > { %s437_s28 = sshll.u32 %s429_s26, 4  ;;  %s2970_s11 = sand.u32 1, %s2400_s23   ;;  %s438_s28 = int_to_ptr.vmem [resolvable:$true] %s437_s28 }
  0x5f   : > { %s426_s19 = scalar_lea.sflag [#allocation3], %s2970_s11  ;;  %s2247_s18 = scalar_lea.vmem %s438_s28, 128 }
  0x60   : > { %p2248_p5 = scmp.ne.s32.totalorder %s438_s28, %s2247_s18  ;;  %p2971_p10 = pneg %p2596_p12 }
  0x61   : > { %s2420_s16 = smov [#allocation2]  }
  0x62   : > { %p2250_p1 = pnand %p2248_p5, %p2971_p10  ;;  %s2252_s21 = sshll.u32 %s2420_s16, 4  ;;  %s2253_s21 = int_to_ptr.vmem [resolvable:$false] %s2252_s21 }
  0x63   : > { %s2254_s17 = scalar_lea.vmem %s2253_s21, 256  ;;  %p2255_p11 = scmp.lt.s32.totalorder %s438_s28, %s2253_s21 }
  0x64   : > { %p2251_p0 = pneg %p2250_p1  ;;  %p2256_p6 = scmp.lt.s32.totalorder %s2254_s17, %s2247_s18 }
  0x66   : > { %p2257_p13 = por %p2256_p6, %p2255_p11 }
  0x68   : > { %p2258_p9 = pnand %p2257_p13, %p2251_p0 }
  0x6a   : > { %2261 = shalt.err (!%p2258_p9)
}
  0x6b   : > { %2030 = dma.hbm_to_vmem [thread:$0]  (!%p2596_p12), %s435_s25, 128, %s438_s28, %s426_s19  }
  0x6c   : > { %s471_s9 = scalar_lea.hbm %s2922_s2, %s2594_s15  ;;  %s466_s26 = scalar_lea.vmem [#allocation7], %s2591_s30 }
  0x6d   : > { %s473_s11 = sshll.u32 %s466_s26, 4  ;;  %p2972_p8 = pmov %p2971_p10  ;;  %s474_s11 = int_to_ptr.vmem [resolvable:$true] %s473_s11 }
  0x6e   : > { %s2275_s16 = scalar_lea.vmem %s474_s11, 128  ;;  %s2421_s18 = smov [#allocation7]  }
  0x6f   : > { %p2276_p4 = scmp.ne.s32.totalorder %s474_s11, %s2275_s16  ;;  %s2280_s21 = sshll.u32 %s2421_s18, 4  ;;  %s2281_s21 = int_to_ptr.vmem [resolvable:$false] %s2280_s21 }
  0x70   : > { %s2282_s17 = scalar_lea.vmem %s2281_s21, 256  ;;  %p2283_p3 = scmp.lt.s32.totalorder %s474_s11, %s2281_s21 }
  0x71   : > { %p2278_p7 = pnand %p2276_p4, %p2972_p8  ;;  %p2284_p5 = scmp.lt.s32.totalorder %s2282_s17, %s2275_s16 }
  0x73   : > { %p2279_p2 = pneg %p2278_p7  ;;  %p2285_p10 = por %p2284_p5, %p2283_p3 }
  0x75   : > { %p2286_p1 = pnand %p2285_p10, %p2279_p2 }
  0x77   : > { %2289 = shalt.err (!%p2286_p1)
}
  0x78   : > { %2036 = dma.hbm_to_vmem [thread:$0]  (!%p2596_p12), %s471_s9, 128, %s474_s11, %s2606_s20  }
  0x79   : > { %p2973_p0 = scmp.ne.s32.totalorder %s2960_s13, 0 }
  0x7a   : > { %s2658_s30 = sand.u32 (!%p2973_p0), 1, %s2396_s22   ;;  %p2974_p11 = scmp.ne.s32.totalorder (!%p2973_p0), %s2957_s29, 0 }
  0x7b   : > { %492 = sbr.rel (%p2973_p0) target bundleno = 1885 (0x75d), region = 64  ;;  %s2661_s15 = sshll.u32 (!%p2973_p0), %s2658_s30, 3 }
  0x7c   : > { %s495_s25 = scalar_lea.sflag (!%p2973_p0), [#allocation3], %s2658_s30  ;;  %s498_s28 = scalar_lea.vmem (!%p2973_p0), [#allocation2], %s2661_s15 }
  0x80   : > { %2367 = dma.done.wait (%p2974_p11), %s495_s25, 128  }
  0x81   : > { %2369 = vsyncadd (%p2974_p11), %s495_s25, 4294967168  ;;  %s503_s4 = sand.u32 1, %s2527_s27   ;;  %s507_s20 = scalar_lea.vmem [#allocation5], %s2661_s15 }
  0x82   : > { %s504_s13 = scalar_lea.sflag [#allocation6], %s503_s4 }
  0x83   : > { %2371 = dma.done.wait (%p2974_p11), %s504_s13, 256  }
  0x84   : > { %2373 = vsyncadd (%p2974_p11), %s504_s13, 4294967040  ;;  %s516_s19 = scalar_lea.vmem [#allocation7], %s2661_s15  ;;  %p2975_p12 = scmp.eq.s32.totalorder %s2527_s27, 0 }
  0x86   : > { %2375 = dma.done.wait (%p2975_p12), [#allocation9], 528   ;;  %p2976_p6 = pmov %p2975_p12 }
  0x88   : > { %2377 = vsyncadd (%p2976_p6), [#allocation9], 4294966768  ;;  %p2977_p13 = pmov %p2976_p6 }
  0x89   : > { %p2978_p9 = pmov %p2976_p6 }
  0x8a   : > { %2379 = dma.done.wait (%p2977_p13), [#allocation12], 16  }
  0x8b   : > { %2381 = vsyncadd (%p2978_p9), [#allocation12], 4294967280  ;;  %v2422_v0 = vmov 0.0   ;;  %vm2423_vm0 = vmmov 0   ;;  %v689_v1 = vld [vmem:[#allocation10 + $0x18] sm:$0xff]  ;;  %v604_v2 = vld [vmem:[%s2923_s3 + $0x18] sm:$0xff] }
  0x8c   : > { %1928 = vmatprep.subr.mxu1 %v2422_v0  ;;  %1917 = vmatprep.subr.mxu0 %v2422_v0  ;;  %v688_v3 = vld [vmem:[#allocation10 + $0x10] sm:$0xff]  ;;  %v603_v4 = vld [vmem:[%s2923_s3 + $0x10] sm:$0xff]  ;;  %v687_v5 = vld [vmem:[#allocation10 + $0x8] sm:$0xff]  ;;  %vm612_vm1 = vcmask 261120   ;;  %vm857_vm2 = vcmask 64512   ;;  %s2424_s18 = smov 120  }
  0x8d   : > { %1936 = vmatprep.mubr.msk.f32.mxu1 %vm2423_vm0, %v2422_v0  ;;  %1925 = vmatprep.mubr.msk.f32.mxu0 %vm2423_vm0, %v2422_v0  ;;  %v602_v6 = vld [vmem:[%s2923_s3 + $0x8] sm:$0xff]  ;;  %v686_v7 = vld [vmem:[#allocation10] sm:$0xff]  ;;  %v601_v8 = vld [vmem:[%s2923_s3] sm:$0xff]  ;;  %s2425_s21 = smov 112   ;;  %s2426_s17 = smov 104  }
  0x8e   : > { %1929 = vmatpush3.msra.mxu1 %v689_v1  ;;  %1918 = vmatpush3.msra.mxu0 %v604_v2  ;;  %v599_v9 = vld [vmem:[%s507_s20] sm:$0xff]  ;;  %v598_v10 = vld [vmem:[%s498_s28] sm:$0xff]  ;;  %p591_p4 = scmp.lt.s32.totalorder %s2404_s24, 1  ;;  %s2979_s4 = sld [smem:[#allocation30_spill]] }
  0x8f   : > { %1930 = vmatprep.subr.mxu1 %v2422_v0  ;;  %1919 = vmatprep.subr.mxu0 %v2422_v0  ;;  %v1856_v11 = vld [vmem:[#allocation11] ss:$0 sm:$0xff]  ;;  %v1854_v12 = vld [vmem:[#allocation8] ss:$0 sm:$0xff]  ;;  %v773_v28 = vld [vmem:[%s2927_s7 + $0x18] sm:$0xff]  ;;  %s2980_s13 = sld [smem:[#allocation27_spill]] }
  0x90   : > { %1931 = vmatpush3.msra.mxu1 %v688_v3  ;;  %1920 = vmatpush3.msra.mxu0 %v603_v4  ;;  %s592_s25 = scalar_select %p591_p4, %s2404_s24, 1  ;;  %v772_v29 = vld [vmem:[%s2927_s7 + $0x10] sm:$0xff]  ;;  %v771_v30 = vld [vmem:[%s2927_s7 + $0x8] sm:$0xff]  ;;  %v770_v31 = vld [vmem:[%s2927_s7] sm:$0xff] }
  0x91   : > { %1932 = vmatprep.subr.mxu1 %v2422_v0  ;;  %1921 = vmatprep.subr.mxu0 %v2422_v0  ;;  %v600_v32 = vld [vmem:[%s516_s19] sm:$0xff]  ;;  %s2981_s12 = sld [smem:[#allocation32_spill]]  ;;  %s1599_s26 = scalar_lea.sflag [#allocation15], %s2658_s30 }
  0x92   : > { %1933 = vmatpush3.msra.mxu1 %v687_v5  ;;  %1922 = vmatpush3.msra.mxu0 %v602_v6  ;;  %s1853_s28 = sshll.u32 %s592_s25, 1  ;;  %v1858_v42 = vld [vmem:[%s2928_s8] ss:$0 sm:$0xff]  ;;  %s2427_s16 = smov [#allocation14]  }
  0x93   : > { %1934 = vmatprep.subr.mxu1 %v2422_v0  ;;  %1923 = vmatprep.subr.mxu0 %v2422_v0  ;;  %s597_s20 = scalar_lea.vmem %s2930_s10, %s1853_s28  ;;  %s2294_s19 = sshll.u32 %s2427_s16, 4  ;;  %s2295_s19 = int_to_ptr.vmem [resolvable:$false] %s2294_s19 }
  0x94   : > { %1935 = vmatpush3.msra.mxu1 %v686_v7  ;;  %1924 = vmatpush3.msra.mxu0 %v601_v8  ;;  %v854_v21 = vld [vmem:[%s597_s20] sm:$0x3]  ;;  %s1883_s20 = sshll.u32 %s2404_s24, 9 }
  0x95   : > { %1937 = vmatmul.mubr.msk.f32.vlgmr.msra.gmra.mxu1 %vm612_vm1, %v599_v9  ;;  %1926 = vmatmul.mubr.msk.f32.vlgmr.msra.gmra.mxu0 %vm612_vm1, %v598_v10  ;;  %v855_v22 = vunpack.c.0.s8 %v854_v21  ;;  %p2982_p7 = scmp.ne.s32.totalorder %s2980_s13, 0 }
  0x96   : > { %1950 = vmatprep.subr.mxu1 %v2422_v0  ;;  %1952 = vmatprep.mubr.msk.f32.mxu1 %vm2423_vm0, %v2422_v0 }
  0x97   : > { %1939 = vmatprep.subr.mxu0 %v2422_v0  ;;  %1947 = vmatprep.mubr.msk.f32.mxu0 %vm2423_vm0, %v2422_v0  ;;  %v2741_v23 = vcvt.s32.f32 %v855_v22  ;;  %s2839_s9 = scalar_lea.hbm %s2981_s12, %s1883_s20 }
  0x98   : > { %1940 = vmatpush3.msra.mxu0 %v773_v28 }
  0x99   : > { %vm934_vm3 = vcmp.gt.f32.partialorder %v2741_v23, 0.0  ;;  %1941 = vmatprep.subr.mxu0 %v2422_v0 }
  0x9a   : > { %1942 = vmatpush3.msra.mxu0 %v772_v29 }
  0x9b   : > { %1943 = vmatprep.subr.mxu0 %v2422_v0 }
  0x9c   : > { %1944 = vmatpush3.msra.mxu0 %v771_v30 }
  0x9d   : > { %1945 = vmatprep.subr.mxu0 %v2422_v0 }
  0x9e   : > { %1946 = vmatpush3.msra.mxu0 %v770_v31 }
  0x9f   : > { %1948 = vmatmul.mubr.msk.f32.vlgmr.msra.gmra.mxu0 %vm612_vm1, %v600_v32  ;;  %1960 = vmatprep.subr.mxu0 %v2422_v0 }
  0xa0   : > { %1962 = vmatprep.mubr.msk.f32.mxu0 %vm2423_vm0, %v2422_v0 }
 0x155   : > { %v766_v13 = vpop.f32.mrf.mxu1  ;;  %v682_v14 = vpop.f32.mrf.mxu0 }
 0x156   : > { %v767_v15 = vadd.f32 %v1856_v11, %v766_v13  ;;  %v2720_v16 = vadd.f32 %v1854_v12, %v682_v14 }
 0x157   : > { %v1938_v17 = vpop.f32.mrf.mxu1  ;;  %v1927_v18 = vpop.f32.mrf.mxu0 }
 0x158   : > { %950 = vrot.lane.b32.xlu0 %v767_v15, %s2424_s18  ;;  %1951 = vmatpush3.xpose.msk.msra.mxu1 %vm857_vm2, %v767_v15 }
 0x159   : > { %1955 = vmatprep.subr.mxu1 %v2422_v0 }
 0x15b   : > { %1953 = vmatmul.mubr.msk.f32.vlgmr.msra.gmra.mxu1 %vm857_vm2, %v2720_v16 }
 0x15c   : > { %948 = vrot.lane.b32.xlu0 %v2720_v16, %s2424_s18  ;;  %1957 = vmatprep.mubr.msk.f32.mxu1 %vm2423_vm0, %v2422_v0  ;;  %s2296_s18 = scalar_lea.vmem %s2295_s19, 1024 }
 0x15f   : > { %v850_v43 = vpop.f32.mrf.mxu0 }
 0x160   : > { %1188 = vrot.lane.b32.xlu0 %v767_v15, %s2425_s21  ;;  %v2778_v44 = vadd.f32 %v1858_v42, %v850_v43 }
 0x161   : > { %v1949_v45 = vpop.f32.mrf.mxu0 }
 0x162   : > { %1961 = vmatpush3.msra.mxu0 %v2778_v44 }
 0x163   : > { %1970 = vmatprep.subr.mxu0 %v2422_v0 }
 0x164   : > { %1354 = vrot.lane.b32.xlu0 %v767_v15, %s2426_s17 }
 0x168   : > { %1352 = vrot.lane.b32.xlu0 %v2720_v16, %s2426_s17  ;;  %s1852_s17 = sshll.u32 %s2658_s30, 5 }
 0x169   : > { %s2787_s25 = scalar_lea.vmem [#allocation14], %s1852_s17 }
 0x16a   : > { %s1627_s29 = sshll.u32 %s2787_s25, 4  ;;  %s2841_s29 = int_to_ptr.vmem [resolvable:$true] %s1627_s29 }
 0x16b   : > { %s2290_s11 = scalar_lea.vmem %s2841_s29, 512  ;;  %p2297_p5 = scmp.lt.s32.totalorder %s2841_s29, %s2295_s19 }
 0x16c   : > { %p2291_p8 = scmp.ne.s32.totalorder %s2841_s29, %s2290_s11  ;;  %p2298_p10 = scmp.lt.s32.totalorder %s2296_s18, %s2290_s11 }
 0x16e   : > { %p2292_p2 = pnand %p2291_p8, %p2982_p7  ;;  %p2299_p1 = por %p2298_p10, %p2297_p5 }
 0x170   : > { %p2293_p3 = pneg %p2292_p2 }
 0x172   : > { %p2300_p0 = pnand %p2299_p1, %p2293_p3 }
 0x1ca   : > { %v951_v19 = vpop.permute.xlu0 %950 }
 0x1cb   : > { %1956 = vmatpush3.xpose.msk.msra.mxu1 %vm857_vm2, %v951_v19 }
 0x1cc   : > { %1965 = vmatprep.subr.mxu1 %v2422_v0 }
 0x1ce   : > { %v949_v20 = vpop.permute.xlu0 %948 }
 0x1cf   : > { %1958 = vmatmul.mubr.msk.f32.vlgmr.msra.gmra.mxu1 %vm857_vm2, %v949_v20 }
 0x1d0   : > { %1967 = vmatprep.mubr.msk.f32.mxu1 %vm2423_vm0, %v2422_v0  ;;  %1966 = vmatpush3.msra.mxu1 %v2778_v44 }
 0x1d1   : > { %1975 = vmatprep.subr.mxu1 %v2422_v0 }
 0x1d2   : > { %v1189_v47 = vpop.permute.xlu0 %1188 }
 0x1d6   : > { %v1355_v50 = vpop.permute.xlu0 %1354 }
 0x1da   : > { %v1353_v52 = vpop.permute.xlu0 %1352 }
 0x21b   : > { %v930_v24 = vpop.f32.mrf.mxu1 }
 0x21c   : > { %v2746_v25 = vsel %vm934_vm3, -1e+09, %v930_v24 }
 0x21d   : > { %v1954_v26 = vpop.f32.mrf.mxu1  ;;  %v936_v27 = vsel %vm857_vm2, %v2746_v25, -inf }
 0x21e   : > { %937 = vmax.xlane.f32.xlu0 %v936_v27  ;;  %v1518_v26 = vld [vmem:[%s2979_s4] sm:$0xff] }
 0x28f   : > { %v1022_v33 = vpop.f32.mrf.mxu1 }
 0x290   : > { %v1026_v34 = vsel %vm934_vm3, -1e+09, %v1022_v33 }
 0x291   : > { %v1959_v35 = vpop.f32.mrf.mxu1  ;;  %v1027_v36 = vsel %vm857_vm2, %v1026_v34, -inf }
 0x292   : > { %1028 = vmax.xlane.f32.xlu1 %v1027_v36 }
 0x2a7   : > { %v938_v53 = vpop.xlane.xlu0 %937 }
 0x2a8   : > { %v939_v54 = vsub.f32 %v2746_v25, %v938_v53 }
 0x2aa   : > { %v940_v55 = vmul.f32 1.442695, %v939_v54 }
 0x31b   : > { %v1029_v37 = vpop.xlane.xlu1 %1028 }
 0x31c   : > { %v1030_v38 = vsub.f32 %v1026_v34, %v1029_v37 }
 0x31e   : > { %v1031_v39 = vmul.f32 1.442695, %v1030_v38 }
 0x320   : > { %2112 = vpow2.f32 %v1031_v39 }
 0x32d   : > { %v2113_v40 = vpop.eup %2112 }
 0x32e   : > { %v1033_v41 = vsel %vm857_vm2, %v2113_v40, 0.0 }
 0x32f   : > { %1034 = vadd.xlane.f32.xlu1 %v1033_v41 }
 0x340   : > { %1186 = vrot.lane.b32.xlu1 %v2720_v16, %s2425_s21 }
 0x3b8   : > { %v1035_v46 = vpop.xlane.xlu1 %1034 }
 0x3b9   : > { %2114 = vrcp.f32 %v1035_v46 }
 0x3ba   : > { %2116 = vpow2.f32 %v940_v55 }
 0x3bc   : > { %v1187_v51 = vpop.permute.xlu1 %1186 }
 0x3c6   : > { %v2115_v48 = vpop.eup %2114 }
 0x3c7   : > { %v1037_v49 = vmul.f32 %v2115_v48, %v2113_v40  ;;  %v2117_v3 = vpop.eup %2116 }
 0x3c8   : > { %v942_v4 = vsel %vm857_vm2, %v2117_v3, 0.0 }
 0x3c9   : > { %1864 = vst.msk [vmem:[%s2787_s25 + $0x8] sm:$0xff] %vm857_vm2, %v1037_v49  ;;  %1963 = vmatmul.mubr.msk.f32.vlgmr.msra.gmra.mxu0 %vm857_vm2, %v1037_v49 }
 0x3ca   : > { %1971 = vmatpush3.xpose.msk.msra.mxu0 %vm857_vm2, %v1189_v47  ;;  %1972 = vmatprep.mubr.msk.f32.mxu0 %vm2423_vm0, %v2422_v0 }
 0x3cb   : > { %1980 = vmatprep.subr.mxu0 %v2422_v0 }
 0x3cd   : > { %1973 = vmatmul.mubr.msk.f32.vlgmr.msra.gmra.mxu0 %vm857_vm2, %v1187_v51 }
 0x3ce   : > { %1981 = vmatpush3.xpose.msk.msra.mxu0 %vm857_vm2, %v1355_v50  ;;  %1982 = vmatprep.mubr.msk.f32.mxu0 %vm2423_vm0, %v2422_v0 }
 0x3cf   : > { %1990 = vmatprep.subr.mxu0 %v2422_v0 }
 0x3d1   : > { %1983 = vmatmul.mubr.msk.f32.vlgmr.msra.gmra.mxu0 %vm857_vm2, %v1353_v52 }
 0x3d2   : > { %1992 = vmatprep.mubr.msk.f32.mxu0 %vm2423_vm0, %v2422_v0  ;;  %1991 = vmatpush3.msra.mxu0 %v1518_v26 }
 0x489   : > { %v1109_v56 = vpop.f32.mrf.mxu0 }
 0x48b   : > { %v1964_v57 = vpop.f32.mrf.mxu0 }
 0x48d   : > { %v1260_v58 = vpop.f32.mrf.mxu0 }
 0x48e   : > { %v1264_v59 = vsel %vm934_vm3, -1e+09, %v1260_v58 }
 0x48f   : > { %v1974_v60 = vpop.f32.mrf.mxu0  ;;  %v1265_v61 = vsel %vm857_vm2, %v1264_v59, -inf }
 0x490   : > { %1266 = vmax.xlane.f32.xlu1 %v1265_v61 }
 0x491   : > { %v1426_v62 = vpop.f32.mrf.mxu0 }
 0x492   : > { %v1430_v63 = vsel %vm934_vm3, -1e+09, %v1426_v62 }
 0x493   : > { %v1984_v1 = vpop.f32.mrf.mxu0  ;;  %v1431_v2 = vsel %vm857_vm2, %v1430_v63, -inf }
 0x494   : > { %1432 = vmax.xlane.f32.xlu0 %v1431_v2 }
 0x498   : > { %943 = vadd.xlane.f32.xlu0 %v942_v4 }
 0x519   : > { %v1267_v5 = vpop.xlane.xlu1 %1266 }
 0x51a   : > { %v1268_v6 = vsub.f32 %v1264_v59, %v1267_v5 }
 0x51c   : > { %v1269_v7 = vmul.f32 1.442695, %v1268_v6 }
 0x51d   : > { %v1433_v8 = vpop.xlane.xlu0 %1432 }
 0x51e   : > { %2118 = vpow2.f32 %v1269_v7  ;;  %v1434_v9 = vsub.f32 %v1430_v63, %v1433_v8 }
 0x520   : > { %v1435_v10 = vmul.f32 1.442695, %v1434_v9 }
 0x521   : > { %v944_v11 = vpop.xlane.xlu0 %943 }
 0x522   : > { %2120 = vpow2.f32 %v1435_v10 }
 0x523   : > { %2122 = vrcp.f32 %v944_v11 }
 0x52b   : > { %v2119_v12 = vpop.eup %2118 }
 0x52c   : > { %v1271_v13 = vsel %vm857_vm2, %v2119_v12, 0.0 }
 0x52d   : > { %1272 = vadd.xlane.f32.xlu0 %v1271_v13 }
 0x52f   : > { %v2121_v14 = vpop.eup %2120 }
 0x530   : > { %v2123_v15 = vpop.eup %2122  ;;  %v1437_v16 = vsel %vm857_vm2, %v2121_v14, 0.0 }
 0x531   : > { %1438 = vadd.xlane.f32.xlu1 %v1437_v16  ;;  %v946_v17 = vmul.f32 %v2123_v15, %v2117_v3 }
 0x533   : > { %947 = vst.msk [vmem:[%s2787_s25] sm:$0xff] %vm857_vm2, %v946_v17  ;;  %1968 = vmatmul.mubr.msk.f32.vlgmr.msra.gmra.mxu1 %vm857_vm2, %v946_v17 }
 0x534   : > { %1976 = vmatpush3.msra.mxu1 %v2778_v44  ;;  %1977 = vmatprep.mubr.msk.f32.mxu1 %vm2423_vm0, %v2422_v0 }
 0x535   : > { %1985 = vmatprep.subr.mxu1 %v2422_v0 }
 0x5b6   : > { %v1273_v18 = vpop.xlane.xlu0 %1272 }
 0x5b7   : > { %2124 = vrcp.f32 %v1273_v18 }
 0x5ba   : > { %v1439_v19 = vpop.xlane.xlu1 %1438 }
 0x5bb   : > { %2126 = vrcp.f32 %v1439_v19 }
 0x5c4   : > { %v2125_v20 = vpop.eup %2124 }
 0x5c5   : > { %v1275_v21 = vmul.f32 %v2125_v20, %v2119_v12 }
 0x5c7   : > { %1869 = vst.msk [vmem:[%s2787_s25 + $0x10] sm:$0xff] %vm857_vm2, %v1275_v21  ;;  %1978 = vmatmul.mubr.msk.f32.vlgmr.msra.gmra.mxu1 %vm857_vm2, %v1275_v21 }
 0x5c8   : > { %v2127_v22 = vpop.eup %2126  ;;  %1986 = vmatpush3.msra.mxu1 %v2778_v44  ;;  %1987 = vmatprep.mubr.msk.f32.mxu1 %vm2423_vm0, %v2422_v0 }
 0x5c9   : > { %v1441_v23 = vmul.f32 %v2127_v22, %v2121_v14 }
 0x5cb   : > { %1873 = vst.msk [vmem:[%s2787_s25 + $0x18] sm:$0xff] %vm857_vm2, %v1441_v23  ;;  %1988 = vmatmul.mubr.msk.f32.vlgmr.msra.gmra.mxu1 %vm857_vm2, %v1441_v23 }
 0x5f3   : > { %v1182_v24 = vpop.f32.mrf.mxu1 }
 0x5f4   : > { %v1183_v28 = vadd.f32 %v1182_v24, %v1109_v56 }
 0x5f5   : > { %v1969_v25 = vpop.f32.mrf.mxu1 }
 0x687   : > { %v1347_v27 = vpop.f32.mrf.mxu1 }
 0x688   : > { %v1351_v0 = vadd.f32 %v1347_v27, %v1183_v28 }
 0x689   : > { %v1979_v29 = vpop.f32.mrf.mxu1 }
 0x68b   : > { %v1513_v30 = vpop.f32.mrf.mxu1 }
 0x68c   : > { %v1517_v31 = vadd.f32 %v1513_v30, %v1351_v0 }
 0x68d   : > { %v1989_v32 = vpop.f32.mrf.mxu1 }
 0x68e   : > { %1993 = vmatmul.mubr.msk.f32.vlgmr.msra.gmra.mxu0 %vm857_vm2, %v1517_v31 }
 0x68f   : > { %2303 = shalt.err (!%p2300_p0)
}
 0x690   : > { %s2304_s17 = scalar_lea.hbm %s2839_s9, 512  ;;  %s2308_s28 = scalar_lea.hbm %s2981_s12, 1024 }
 0x691   : > { %p2305_p11 = scmp.ne.s32.totalorder %s2839_s9, %s2304_s17  ;;  %p2309_p13 = scmp.lt.s32.totalorder %s2839_s9, %s2981_s12 }
 0x692   : > { %p2310_p9 = scmp.lt.s32.totalorder %s2308_s28, %s2304_s17 }
 0x693   : > { %p2306_p12 = pnand %p2305_p11, %p2982_p7 }
 0x694   : > { %p2311_p4 = por %p2310_p9, %p2309_p13 }
 0x695   : > { %p2307_p6 = pneg %p2306_p12 }
 0x697   : > { %p2312_p8 = pnand %p2311_p4, %p2307_p6 }
 0x699   : > { %2315 = shalt.err (!%p2312_p8)
}
 0x69a   : > { %s2428_s14 = smov 128   ;;  %s2429_s27 = smov 8  }
 0x69b   : > { %2014 = dma.vmem_to_hbm [thread:$0]  (%p2982_p7), %s2841_s29, 512, %s2839_s9, %s1599_s26, %s2428_s14, %s2428_s14, %s2429_s27  }
 0x69c   : > { %s1878_s11 = sshll.u32 %s2404_s24, 7  ;;  %s583_s16 = scalar_lea.vmem [#allocation13], %s2661_s15 }
 0x69d   : > { %s1613_s19 = sshll.u32 %s583_s16, 4  ;;  %s2983_s25 = sld [smem:[#allocation31_spill]]  ;;  %s2873_s19 = int_to_ptr.vmem [resolvable:$true] %s1613_s19 }
 0x69e   : > { %s1594_s4 = scalar_lea.sflag [#allocation4], %s2658_s30  ;;  %s2316_s20 = scalar_lea.vmem %s2873_s19, 128 }
 0x69f   : > { %p2317_p2 = scmp.ne.s32.totalorder %s2873_s19, %s2316_s20  ;;  %s2430_s24 = smov [#allocation13]  }
 0x6a0   : > { %s2320_s15 = sshll.u32 %s2430_s24, 4  ;;  %s2321_s15 = int_to_ptr.vmem [resolvable:$false] %s2320_s15 }
 0x6a1   : > { %p2318_p3 = pnand %p2317_p2, %p2982_p7  ;;  %s2322_s29 = scalar_lea.vmem %s2321_s15, 256 }
 0x6a2   : > { %p2323_p10 = scmp.lt.s32.totalorder %s2873_s19, %s2321_s15  ;;  %p2324_p1 = scmp.lt.s32.totalorder %s2322_s29, %s2316_s20 }
 0x6a3   : > { %s2984_s28 = smov %s2983_s25  ;;  %s2871_s21 = scalar_lea.hbm %s2983_s25, %s1878_s11 }
 0x6a4   : > { %p2319_p5 = pneg %p2318_p3  ;;  %p2325_p0 = por %p2324_p1, %p2323_p10 }
 0x6a6   : > { %p2326_p11 = pnand %p2325_p0, %p2319_p5 }
 0x74e   : > { %v1588_v33 = vpop.f32.mrf.mxu0 }
 0x74f   : > { %1592 = vst.msk [vmem:[%s583_s16] sm:$0xff] %vm612_vm1, %v1588_v33 }
 0x750   : > { %v1994_v34 = vpop.f32.mrf.mxu0 }
 0x751   : > { %2329 = shalt.err (!%p2326_p11)
}
 0x752   : > { %s2330_s9 = scalar_lea.hbm %s2871_s21, 128  ;;  %s2334_s14 = scalar_lea.hbm %s2984_s28, 256 }
 0x753   : > { %p2331_p12 = scmp.ne.s32.totalorder %s2871_s21, %s2330_s9  ;;  %p2335_p9 = scmp.lt.s32.totalorder %s2871_s21, %s2984_s28 }
 0x754   : > { %p2336_p4 = scmp.lt.s32.totalorder %s2334_s14, %s2330_s9 }
 0x755   : > { %p2332_p6 = pnand %p2331_p12, %p2982_p7 }
 0x756   : > { %p2337_p8 = por %p2336_p4, %p2335_p9 }
 0x757   : > { %p2333_p13 = pneg %p2332_p6 }
 0x759   : > { %p2338_p2 = pnand %p2337_p8, %p2333_p13 }
 0x75b   : > { %2341 = shalt.err (!%p2338_p2)
}
 0x75c   : > { %2013 = dma.vmem_to_hbm [thread:$0]  (%p2982_p7), %s2873_s19, 128, %s2871_s21, %s1594_s4  }
 0x75d PF: > { %s2985_s16 = sld [smem:[#allocation22_spill]] }
 0x75e   : > { %s2986_s18 = sld [smem:[#allocation25_spill]] }
 0x75f   : > { %s2987_s17 = sld [smem:[#allocation24_spill]] }
 0x763   : > { %s1642_s25 = sand.u32 1, %s2985_s16  }
 0x764   : > { %p2988_p3 = scmp.ne.s32.totalorder %s2986_s18, 0  ;;  %s1643_s20 = scalar_lea.sflag [#allocation4], %s1642_s25 }
 0x765   : > { %p2989_p5 = scmp.ge.s32.totalorder %s2987_s17, 2 }
 0x767   : > { %p2038_p10 = pnand %p2989_p5, %p2988_p3 }
 0x769   : > { %p2039_p1 = pneg %p2038_p10 }
 0x76b   : > { %2383 = dma.done.wait (%p2039_p1), %s1643_s20, 128  }
 0x76c   : > { %2385 = vsyncadd (%p2039_p1), %s1643_s20, 4294967168  ;;  %s1652_s24 = scalar_lea.sflag [#allocation15], %s1642_s25 }
 0x76d   : > { %2387 = dma.done.wait (%p2039_p1), %s1652_s24, 512  }
 0x76e   : > { %2389 = vsyncadd (%p2039_p1), %s1652_s24, 4294966784  ;;  %s37_s26 = sadd.s32 1, %s2987_s17   ;;  %s2990_s13 = sld [smem:[#allocation28_spill]] }
 0x76f   : > { %p34_p0 = scmp.ge.s32.totalorder %s37_s26, 4   ;;  %s2991_s24 = sld [smem:[#allocation23_spill]] }
 0x770   : > { %s2992_s25 = sld [smem:[#allocation26_spill]]  ;;  %s2993_s21 = smov %s2396_s22 }
 0x771   : > { %s2994_s22 = smov %s2400_s23  ;;  %36 = sbr.rel (!%p34_p0) target bundleno = 17 (0x11), region = 168 }
 0x774   : > { %s2995_s23 = smov %s2990_s13 }
 0x776   :  { %1657 = vsyncpa [#allocation3], 1 }
 0x777   :  { %1659 = vsyncpa [#allocation3 + $0x1], 1 }
 0x778   :  { %1660 = vsyncpa [#allocation6], 1 }
 0x779   :  { %1662 = vsyncpa [#allocation6 + $0x1], 1 }
 0x77a   :  { %1663 = vsyncpa [#allocation9], 1 }
 0x77b   :  { %1664 = vsyncpa [#allocation12], 1 }
 0x77c   :  { %1665 = vsyncpa [#allocation4], 1 }
 0x77d   :  { %1667 = vsyncpa [#allocation4 + $0x1], 1 }
 0x77e   :  { %1668 = vsyncpa [#allocation15], 1 }
 0x77f   :  { %1670 = vsyncpa [#allocation15 + $0x1], 1 }

</bundles_post_ra>
